<compile_context>
chip_gen: v5e
topology: v5e:2x2
jax: 0.10.0
libtpu: 0.0.40
codegen_flags: <defaults>
</compile_context>

<pallas_src>
import jax
import jax.numpy as jnp
from jax.experimental import pallas as pl
from jax.experimental.pallas import tpu as pltpu


def _make_kernel(L, D, F_):
    """Build the kernel closed over the static problem dims."""

    def kernel(x_ref, w_ref, b_ref, o_ref):
        # x_ref: [TB, L*D] (VMEM)   w_ref: [F, L] (SMEM)   b_ref: [F] (SMEM)
        # o_ref: [TB, F*D] (VMEM)
        x = x_ref[...].astype(jnp.float32)
        # Static [TB, D] slices of the lane-dense input tile, one per seq step.
        xs = [x[:, l * D:(l + 1) * D] for l in range(L)]
        pieces = []
        for f in range(F_):
            acc = xs[0] * w_ref[f, 0]
            for l in range(1, L):
                acc = acc + xs[l] * w_ref[f, l]
            pieces.append(jnp.maximum(acc + b_ref[f], 0.0))
        # Column order f*D + d matches torch's [B, F, D].reshape(B, -1).
        out = pieces[0] if F_ == 1 else jnp.concatenate(pieces, axis=-1)
        o_ref[...] = out.astype(o_ref.dtype)

    return kernel


def _vmem_capacity_bytes():
    try:
        return int(pltpu.get_tpu_info().vmem_capacity_bytes)
    except Exception:
        return 64 * 1024 * 1024  # conservative: v7x per-core VMEM


def _choose_tb(B, LD, FD):
    """Pick the batch-tile size TB (rows per grid step)."""
    vmem_cap = _vmem_capacity_bytes()
    # Working set per batch row: double-buffered input + output tiles, f32.
    per_row = 2 * (LD + FD) * 4
    tb = (vmem_cap // 2) // per_row            # generous headroom
    tb = max(8, min(1024, tb // 8 * 8))        # 512-1024 rows ~ HBM roofline
    # Pipeline depth: large batches should yield >= 8 grid steps in total
    # (>= 4 per TensorCore on v7x) so input DMA / writeback overlap compute.
    min_steps = 8
    if B > 8 * min_steps:
        tb = min(tb, max(8, ((-(-B // min_steps)) + 7) // 8 * 8))
    if B <= tb:
        tb = B   # single block covering the whole (small) batch
    return tb


def vertical_convolution(x, weight, bias, *, tb=None):
    """x: [B, L, D], weight: [F, L], bias: [F]  ->  [B, F*D] (relu'ed conv)."""
    B, L, D = x.shape
    F_, Lw = weight.shape
    assert Lw == L and bias.shape == (F_,)
    LD, FD = L * D, F_ * D

    TB = _choose_tb(B, LD, FD) if tb is None else min(int(tb), B)
    if TB < B:
        assert TB % 8 == 0, "batch tile must be a multiple of 8"

    # Metadata-only reshape (no copy): x_flat[b, l*D + d] = x[b, l, d].
    x_flat = x.reshape(B, LD)

    # VMEM limit derived from the actual working set (double-buffered x and
    # out tiles); weight/bias live in SMEM and cost no VMEM.
    ws = 2 * TB * (LD + FD) * 4
    vmem_limit = int(min(_vmem_capacity_bytes(), max(16 * 1024 * 1024, 2 * ws)))

    out = pl.pallas_call(
        _make_kernel(L, D, F_),
        out_shape=jax.ShapeDtypeStruct((B, FD), x.dtype),
        # Partial last block (B % TB != 0) is masked by Pallas: no pad copy.
        grid=(pl.cdiv(B, TB),),
        in_specs=[
            pl.BlockSpec((TB, LD), lambda i: (i, 0)),            # batch tile of x
            pl.BlockSpec(memory_space=pltpu.MemorySpace.SMEM),   # tiny [F, L] weight
            pl.BlockSpec(memory_space=pltpu.MemorySpace.SMEM),   # tiny [F] bias
        ],
        out_specs=pl.BlockSpec((TB, FD), lambda i: (i, 0)),
        compiler_params=pltpu.CompilerParams(
            dimension_semantics=("parallel",),
            vmem_limit_bytes=vmem_limit,
        ),
    )(x_flat, weight, bias)
    return out


def _reference(x, weight, bias):
    # Pure-JAX reference of the PyTorch forward.
    out = jnp.einsum("fl,bld->bfd", weight, x) + bias[None, :, None]
    out = jnp.maximum(out, 0.0)
    return out.reshape(x.shape[0], -1)


if __name__ == "__main__":
    # Small shapes consistent with the module: batch=2, seq_len=8, emb=32,
    # num_filters=4  (so F*D = 128 -> lane-dense output).
    B, L, D, F_ = 2, 8, 32, 4

    key = jax.random.PRNGKey(0)
    kx, kw, kb = jax.random.split(key, 3)

    x = jax.random.normal(kx, (B, L, D), dtype=jnp.float32)
    # Conv2d(1, F, (L, 1)) weight has shape [F, 1, L, 1]; squeezed to [F, L].
    weight = jax.random.normal(kw, (F_, L), dtype=jnp.float32) * 0.1
    bias = jax.random.normal(kb, (F_,), dtype=jnp.float32) * 0.1

    out = jax.block_until_ready(vertical_convolution(x, weight, bias))
    ref = _reference(x, weight, bias)
    assert out.shape == (B, F_ * D), out.shape
    assert jnp.allclose(out, ref, atol=1e-5, rtol=1e-5), "mismatch vs reference"

    # Extra check: multi-block grid with an uneven (masked) last block and no
    # input padding (B=50, TB=16 -> 4 grid steps, last block partially OOB).
    B2 = 50
    x2 = jax.random.normal(jax.random.PRNGKey(1), (B2, L, D), dtype=jnp.float32)
    out2 = jax.block_until_ready(vertical_convolution(x2, weight, bias, tb=16))
    assert out2.shape == (B2, F_ * D), out2.shape
    assert jnp.allclose(out2, _reference(x2, weight, bias), atol=1e-5, rtol=1e-5)

    print("KERNEL_OK")
</pallas_src>

<mosaic_0001>
module attributes {stable_mosaic.version = 11 : i64} {
  func.func @kernel(%arg0: i32, %arg1: memref<2x256xf32, #tpu.memory_space<vmem>>, %arg2: memref<4x8xf32, #tpu.memory_space<smem>>, %arg3: memref<4xf32, #tpu.memory_space<smem>>, %arg4: memref<2x128xf32, #tpu.memory_space<vmem>>) attributes {dimension_semantics = [#tpu.dimension_semantics<parallel>], iteration_bounds = array<i64: 1>, scalar_prefetch = 0 : i64, scratch_operands = 0 : i64, tpu.core_type = #tpu.core_type<tc>, window_params = [{transform_indices = @transform_0, window_bounds = array<i64: 2, 256>}, {transform_indices = @transform_1, window_bounds = array<i64: 4, 8>}, {transform_indices = @transform_2, window_bounds = array<i64: 4>}, {transform_indices = @transform_3, window_bounds = array<i64: 2, 128>}]} {
    %c0 = arith.constant 0 : index
    %c0_0 = arith.constant 0 : index
    %0 = vector.load %arg1[%c0, %c0_0] : memref<2x256xf32, #tpu.memory_space<vmem>>, vector<2x256xf32>
    %1 = vector.extract_strided_slice %0 {offsets = [0, 0], sizes = [2, 32], strides = [1, 1]} : vector<2x256xf32> to vector<2x32xf32>
    %2 = vector.extract_strided_slice %0 {offsets = [0, 32], sizes = [2, 32], strides = [1, 1]} : vector<2x256xf32> to vector<2x32xf32>
    %3 = vector.extract_strided_slice %0 {offsets = [0, 64], sizes = [2, 32], strides = [1, 1]} : vector<2x256xf32> to vector<2x32xf32>
    %4 = vector.extract_strided_slice %0 {offsets = [0, 96], sizes = [2, 32], strides = [1, 1]} : vector<2x256xf32> to vector<2x32xf32>
    %5 = vector.extract_strided_slice %0 {offsets = [0, 128], sizes = [2, 32], strides = [1, 1]} : vector<2x256xf32> to vector<2x32xf32>
    %6 = vector.extract_strided_slice %0 {offsets = [0, 160], sizes = [2, 32], strides = [1, 1]} : vector<2x256xf32> to vector<2x32xf32>
    %7 = vector.extract_strided_slice %0 {offsets = [0, 192], sizes = [2, 32], strides = [1, 1]} : vector<2x256xf32> to vector<2x32xf32>
    %8 = vector.extract_strided_slice %0 {offsets = [0, 224], sizes = [2, 32], strides = [1, 1]} : vector<2x256xf32> to vector<2x32xf32>
    %c0_1 = arith.constant 0 : index
    %c0_2 = arith.constant 0 : index
    %9 = memref.load %arg2[%c0_1, %c0_2] : memref<4x8xf32, #tpu.memory_space<smem>>
    %10 = vector.broadcast %9 : f32 to vector<2x32xf32>
    %11 = arith.mulf %1, %10 : vector<2x32xf32>
    %c0_3 = arith.constant 0 : index
    %c1 = arith.constant 1 : index
    %12 = memref.load %arg2[%c0_3, %c1] : memref<4x8xf32, #tpu.memory_space<smem>>
    %13 = vector.broadcast %12 : f32 to vector<2x32xf32>
    %14 = arith.mulf %2, %13 : vector<2x32xf32>
    %15 = arith.addf %11, %14 : vector<2x32xf32>
    %c0_4 = arith.constant 0 : index
    %c2 = arith.constant 2 : index
    %16 = memref.load %arg2[%c0_4, %c2] : memref<4x8xf32, #tpu.memory_space<smem>>
    %17 = vector.broadcast %16 : f32 to vector<2x32xf32>
    %18 = arith.mulf %3, %17 : vector<2x32xf32>
    %19 = arith.addf %15, %18 : vector<2x32xf32>
    %c0_5 = arith.constant 0 : index
    %c3 = arith.constant 3 : index
    %20 = memref.load %arg2[%c0_5, %c3] : memref<4x8xf32, #tpu.memory_space<smem>>
    %21 = vector.broadcast %20 : f32 to vector<2x32xf32>
    %22 = arith.mulf %4, %21 : vector<2x32xf32>
    %23 = arith.addf %19, %22 : vector<2x32xf32>
    %c0_6 = arith.constant 0 : index
    %c4 = arith.constant 4 : index
    %24 = memref.load %arg2[%c0_6, %c4] : memref<4x8xf32, #tpu.memory_space<smem>>
    %25 = vector.broadcast %24 : f32 to vector<2x32xf32>
    %26 = arith.mulf %5, %25 : vector<2x32xf32>
    %27 = arith.addf %23, %26 : vector<2x32xf32>
    %c0_7 = arith.constant 0 : index
    %c5 = arith.constant 5 : index
    %28 = memref.load %arg2[%c0_7, %c5] : memref<4x8xf32, #tpu.memory_space<smem>>
    %29 = vector.broadcast %28 : f32 to vector<2x32xf32>
    %30 = arith.mulf %6, %29 : vector<2x32xf32>
    %31 = arith.addf %27, %30 : vector<2x32xf32>
    %c0_8 = arith.constant 0 : index
    %c6 = arith.constant 6 : index
    %32 = memref.load %arg2[%c0_8, %c6] : memref<4x8xf32, #tpu.memory_space<smem>>
    %33 = vector.broadcast %32 : f32 to vector<2x32xf32>
    %34 = arith.mulf %7, %33 : vector<2x32xf32>
    %35 = arith.addf %31, %34 : vector<2x32xf32>
    %c0_9 = arith.constant 0 : index
    %c7 = arith.constant 7 : index
    %36 = memref.load %arg2[%c0_9, %c7] : memref<4x8xf32, #tpu.memory_space<smem>>
    %37 = vector.broadcast %36 : f32 to vector<2x32xf32>
    %38 = arith.mulf %8, %37 : vector<2x32xf32>
    %39 = arith.addf %35, %38 : vector<2x32xf32>
    %c0_10 = arith.constant 0 : index
    %40 = memref.load %arg3[%c0_10] : memref<4xf32, #tpu.memory_space<smem>>
    %41 = vector.broadcast %40 : f32 to vector<2x32xf32>
    %42 = arith.addf %39, %41 : vector<2x32xf32>
    %cst = arith.constant 0.000000e+00 : f32
    %43 = vector.broadcast %cst : f32 to vector<2x32xf32>
    %44 = arith.maximumf %42, %43 : vector<2x32xf32>
    %c1_11 = arith.constant 1 : index
    %c0_12 = arith.constant 0 : index
    %45 = memref.load %arg2[%c1_11, %c0_12] : memref<4x8xf32, #tpu.memory_space<smem>>
    %46 = vector.broadcast %45 : f32 to vector<2x32xf32>
    %47 = arith.mulf %1, %46 : vector<2x32xf32>
    %c1_13 = arith.constant 1 : index
    %c1_14 = arith.constant 1 : index
    %48 = memref.load %arg2[%c1_13, %c1_14] : memref<4x8xf32, #tpu.memory_space<smem>>
    %49 = vector.broadcast %48 : f32 to vector<2x32xf32>
    %50 = arith.mulf %2, %49 : vector<2x32xf32>
    %51 = arith.addf %47, %50 : vector<2x32xf32>
    %c1_15 = arith.constant 1 : index
    %c2_16 = arith.constant 2 : index
    %52 = memref.load %arg2[%c1_15, %c2_16] : memref<4x8xf32, #tpu.memory_space<smem>>
    %53 = vector.broadcast %52 : f32 to vector<2x32xf32>
    %54 = arith.mulf %3, %53 : vector<2x32xf32>
    %55 = arith.addf %51, %54 : vector<2x32xf32>
    %c1_17 = arith.constant 1 : index
    %c3_18 = arith.constant 3 : index
    %56 = memref.load %arg2[%c1_17, %c3_18] : memref<4x8xf32, #tpu.memory_space<smem>>
    %57 = vector.broadcast %56 : f32 to vector<2x32xf32>
    %58 = arith.mulf %4, %57 : vector<2x32xf32>
    %59 = arith.addf %55, %58 : vector<2x32xf32>
    %c1_19 = arith.constant 1 : index
    %c4_20 = arith.constant 4 : index
    %60 = memref.load %arg2[%c1_19, %c4_20] : memref<4x8xf32, #tpu.memory_space<smem>>
    %61 = vector.broadcast %60 : f32 to vector<2x32xf32>
    %62 = arith.mulf %5, %61 : vector<2x32xf32>
    %63 = arith.addf %59, %62 : vector<2x32xf32>
    %c1_21 = arith.constant 1 : index
    %c5_22 = arith.constant 5 : index
    %64 = memref.load %arg2[%c1_21, %c5_22] : memref<4x8xf32, #tpu.memory_space<smem>>
    %65 = vector.broadcast %64 : f32 to vector<2x32xf32>
    %66 = arith.mulf %6, %65 : vector<2x32xf32>
    %67 = arith.addf %63, %66 : vector<2x32xf32>
    %c1_23 = arith.constant 1 : index
    %c6_24 = arith.constant 6 : index
    %68 = memref.load %arg2[%c1_23, %c6_24] : memref<4x8xf32, #tpu.memory_space<smem>>
    %69 = vector.broadcast %68 : f32 to vector<2x32xf32>
    %70 = arith.mulf %7, %69 : vector<2x32xf32>
    %71 = arith.addf %67, %70 : vector<2x32xf32>
    %c1_25 = arith.constant 1 : index
    %c7_26 = arith.constant 7 : index
    %72 = memref.load %arg2[%c1_25, %c7_26] : memref<4x8xf32, #tpu.memory_space<smem>>
    %73 = vector.broadcast %72 : f32 to vector<2x32xf32>
    %74 = arith.mulf %8, %73 : vector<2x32xf32>
    %75 = arith.addf %71, %74 : vector<2x32xf32>
    %c1_27 = arith.constant 1 : index
    %76 = memref.load %arg3[%c1_27] : memref<4xf32, #tpu.memory_space<smem>>
    %77 = vector.broadcast %76 : f32 to vector<2x32xf32>
    %78 = arith.addf %75, %77 : vector<2x32xf32>
    %cst_28 = arith.constant 0.000000e+00 : f32
    %79 = vector.broadcast %cst_28 : f32 to vector<2x32xf32>
    %80 = arith.maximumf %78, %79 : vector<2x32xf32>
    %c2_29 = arith.constant 2 : index
    %c0_30 = arith.constant 0 : index
    %81 = memref.load %arg2[%c2_29, %c0_30] : memref<4x8xf32, #tpu.memory_space<smem>>
    %82 = vector.broadcast %81 : f32 to vector<2x32xf32>
    %83 = arith.mulf %1, %82 : vector<2x32xf32>
    %c2_31 = arith.constant 2 : index
    %c1_32 = arith.constant 1 : index
    %84 = memref.load %arg2[%c2_31, %c1_32] : memref<4x8xf32, #tpu.memory_space<smem>>
    %85 = vector.broadcast %84 : f32 to vector<2x32xf32>
    %86 = arith.mulf %2, %85 : vector<2x32xf32>
    %87 = arith.addf %83, %86 : vector<2x32xf32>
    %c2_33 = arith.constant 2 : index
    %c2_34 = arith.constant 2 : index
    %88 = memref.load %arg2[%c2_33, %c2_34] : memref<4x8xf32, #tpu.memory_space<smem>>
    %89 = vector.broadcast %88 : f32 to vector<2x32xf32>
    %90 = arith.mulf %3, %89 : vector<2x32xf32>
    %91 = arith.addf %87, %90 : vector<2x32xf32>
    %c2_35 = arith.constant 2 : index
    %c3_36 = arith.constant 3 : index
    %92 = memref.load %arg2[%c2_35, %c3_36] : memref<4x8xf32, #tpu.memory_space<smem>>
    %93 = vector.broadcast %92 : f32 to vector<2x32xf32>
    %94 = arith.mulf %4, %93 : vector<2x32xf32>
    %95 = arith.addf %91, %94 : vector<2x32xf32>
    %c2_37 = arith.constant 2 : index
    %c4_38 = arith.constant 4 : index
    %96 = memref.load %arg2[%c2_37, %c4_38] : memref<4x8xf32, #tpu.memory_space<smem>>
    %97 = vector.broadcast %96 : f32 to vector<2x32xf32>
    %98 = arith.mulf %5, %97 : vector<2x32xf32>
    %99 = arith.addf %95, %98 : vector<2x32xf32>
    %c2_39 = arith.constant 2 : index
    %c5_40 = arith.constant 5 : index
    %100 = memref.load %arg2[%c2_39, %c5_40] : memref<4x8xf32, #tpu.memory_space<smem>>
    %101 = vector.broadcast %100 : f32 to vector<2x32xf32>
    %102 = arith.mulf %6, %101 : vector<2x32xf32>
    %103 = arith.addf %99, %102 : vector<2x32xf32>
    %c2_41 = arith.constant 2 : index
    %c6_42 = arith.constant 6 : index
    %104 = memref.load %arg2[%c2_41, %c6_42] : memref<4x8xf32, #tpu.memory_space<smem>>
    %105 = vector.broadcast %104 : f32 to vector<2x32xf32>
    %106 = arith.mulf %7, %105 : vector<2x32xf32>
    %107 = arith.addf %103, %106 : vector<2x32xf32>
    %c2_43 = arith.constant 2 : index
    %c7_44 = arith.constant 7 : index
    %108 = memref.load %arg2[%c2_43, %c7_44] : memref<4x8xf32, #tpu.memory_space<smem>>
    %109 = vector.broadcast %108 : f32 to vector<2x32xf32>
    %110 = arith.mulf %8, %109 : vector<2x32xf32>
    %111 = arith.addf %107, %110 : vector<2x32xf32>
    %c2_45 = arith.constant 2 : index
    %112 = memref.load %arg3[%c2_45] : memref<4xf32, #tpu.memory_space<smem>>
    %113 = vector.broadcast %112 : f32 to vector<2x32xf32>
    %114 = arith.addf %111, %113 : vector<2x32xf32>
    %cst_46 = arith.constant 0.000000e+00 : f32
    %115 = vector.broadcast %cst_46 : f32 to vector<2x32xf32>
    %116 = arith.maximumf %114, %115 : vector<2x32xf32>
    %c3_47 = arith.constant 3 : index
    %c0_48 = arith.constant 0 : index
    %117 = memref.load %arg2[%c3_47, %c0_48] : memref<4x8xf32, #tpu.memory_space<smem>>
    %118 = vector.broadcast %117 : f32 to vector<2x32xf32>
    %119 = arith.mulf %1, %118 : vector<2x32xf32>
    %c3_49 = arith.constant 3 : index
    %c1_50 = arith.constant 1 : index
    %120 = memref.load %arg2[%c3_49, %c1_50] : memref<4x8xf32, #tpu.memory_space<smem>>
    %121 = vector.broadcast %120 : f32 to vector<2x32xf32>
    %122 = arith.mulf %2, %121 : vector<2x32xf32>
    %123 = arith.addf %119, %122 : vector<2x32xf32>
    %c3_51 = arith.constant 3 : index
    %c2_52 = arith.constant 2 : index
    %124 = memref.load %arg2[%c3_51, %c2_52] : memref<4x8xf32, #tpu.memory_space<smem>>
    %125 = vector.broadcast %124 : f32 to vector<2x32xf32>
    %126 = arith.mulf %3, %125 : vector<2x32xf32>
    %127 = arith.addf %123, %126 : vector<2x32xf32>
    %c3_53 = arith.constant 3 : index
    %c3_54 = arith.constant 3 : index
    %128 = memref.load %arg2[%c3_53, %c3_54] : memref<4x8xf32, #tpu.memory_space<smem>>
    %129 = vector.broadcast %128 : f32 to vector<2x32xf32>
    %130 = arith.mulf %4, %129 : vector<2x32xf32>
    %131 = arith.addf %127, %130 : vector<2x32xf32>
    %c3_55 = arith.constant 3 : index
    %c4_56 = arith.constant 4 : index
    %132 = memref.load %arg2[%c3_55, %c4_56] : memref<4x8xf32, #tpu.memory_space<smem>>
    %133 = vector.broadcast %132 : f32 to vector<2x32xf32>
    %134 = arith.mulf %5, %133 : vector<2x32xf32>
    %135 = arith.addf %131, %134 : vector<2x32xf32>
    %c3_57 = arith.constant 3 : index
    %c5_58 = arith.constant 5 : index
    %136 = memref.load %arg2[%c3_57, %c5_58] : memref<4x8xf32, #tpu.memory_space<smem>>
    %137 = vector.broadcast %136 : f32 to vector<2x32xf32>
    %138 = arith.mulf %6, %137 : vector<2x32xf32>
    %139 = arith.addf %135, %138 : vector<2x32xf32>
    %c3_59 = arith.constant 3 : index
    %c6_60 = arith.constant 6 : index
    %140 = memref.load %arg2[%c3_59, %c6_60] : memref<4x8xf32, #tpu.memory_space<smem>>
    %141 = vector.broadcast %140 : f32 to vector<2x32xf32>
    %142 = arith.mulf %7, %141 : vector<2x32xf32>
    %143 = arith.addf %139, %142 : vector<2x32xf32>
    %c3_61 = arith.constant 3 : index
    %c7_62 = arith.constant 7 : index
    %144 = memref.load %arg2[%c3_61, %c7_62] : memref<4x8xf32, #tpu.memory_space<smem>>
    %145 = vector.broadcast %144 : f32 to vector<2x32xf32>
    %146 = arith.mulf %8, %145 : vector<2x32xf32>
    %147 = arith.addf %143, %146 : vector<2x32xf32>
    %c3_63 = arith.constant 3 : index
    %148 = memref.load %arg3[%c3_63] : memref<4xf32, #tpu.memory_space<smem>>
    %149 = vector.broadcast %148 : f32 to vector<2x32xf32>
    %150 = arith.addf %147, %149 : vector<2x32xf32>
    %cst_64 = arith.constant 0.000000e+00 : f32
    %151 = vector.broadcast %cst_64 : f32 to vector<2x32xf32>
    %152 = arith.maximumf %150, %151 : vector<2x32xf32>
    %153 = tpu.concatenate %44, %80, %116, %152 in 1 : vector<2x32xf32>, vector<2x32xf32>, vector<2x32xf32>, vector<2x32xf32> -> vector<2x128xf32>
    %c0_65 = arith.constant 0 : index
    %c0_66 = arith.constant 0 : index
    %154 = vector.load %arg4[%c0_65, %c0_66] : memref<2x128xf32, #tpu.memory_space<vmem>>, vector<2x128xf32>
    tpu.vector_store %arg4[%c0_65, %c0_66], %153 {strides = array<i32>} : memref<2x128xf32, #tpu.memory_space<vmem>>, vector<2x128xf32>,
    return
  }
  func.func @transform_0(%arg0: i32) -> (i32, i32) {
    %c0_i32 = arith.constant 0 : i32
    %c0_i32_0 = arith.constant 0 : i32
    return %arg0, %c0_i32 : i32, i32
  }
  func.func @transform_1(%arg0: i32) -> (i32, i32) {
    %c0_i32 = arith.constant 0 : i32
    %c0_i32_0 = arith.constant 0 : i32
    %c0_i32_1 = arith.constant 0 : i32
    return %c0_i32, %c0_i32_0 : i32, i32
  }
  func.func @transform_2(%arg0: i32) -> i32 {
    %c0_i32 = arith.constant 0 : i32
    %c0_i32_0 = arith.constant 0 : i32
    return %c0_i32 : i32
  }
  func.func @transform_3(%arg0: i32) -> (i32, i32) {
    %c0_i32 = arith.constant 0 : i32
    %c0_i32_0 = arith.constant 0 : i32
    return %arg0, %c0_i32 : i32, i32
  }
}

</mosaic_0001>

<bundles_post_ra>
// kernel: tpu_custom_call.1
= control target key start
LH: loop header
LB: loop body
LE: loop exit
PB: predicated region body
PF: predicated region fallthrough
CT: control target
= control target key end

     0   :  { %8 = vsyncpa [#allocation3], 0  ;;  %s574_s0 = inlined_call_operand.hbm [shape: f32[2,256], index: 0, kind: input, shape index: {}]   ;;  %s575_s1 = inlined_call_operand.hbm [shape: f32[4,8], index: 1, kind: input, shape index: {}]   ;;  %s576_s2 = inlined_call_operand.vmem [shape: f32[4], index: 2, kind: input, shape index: {}]   ;;  %s577_s3 = inlined_call_operand.hbm [shape: f32[2,128], index: 3, kind: output, shape index: {}]  }
   0x1   :  { %9 = vsyncpa [#allocation5], 0 }
   0x2   :  { %10 = vsyncpa [#allocation6], 0 }
   0x3   :  { %11 = vsyncpa [#allocation4], 0  ;;  %s17_s14 = sshll.u32 %s574_s0, 4  ;;  %s423_s15 = smov [#allocation2]   ;;  %s18_s14 = int_to_ptr.hbm [resolvable:$true] %s17_s14 }
   0x4   :  { %s19_s16 = sshll.u32 %s423_s15, 4  ;;  %s28_s19 = sshll.u32 %s575_s1, 4  ;;  %s20_s16 = int_to_ptr.vmem [resolvable:$true] %s19_s16  ;;  %s29_s19 = int_to_ptr.hbm [resolvable:$true] %s28_s19 }
   0x5   :  { %22 = dma.hbm_to_vmem [thread:$0]  %s18_s14, 64, %s20_s16, [#allocation3]  }
   0x6   :  { %s424_s20 = smov [#allocation7]   ;;  %s37_s23 = sshll.u32 %s576_s2, 4  ;;  %s38_s23 = int_to_ptr.vmem [resolvable:$true] %s37_s23 }
   0x7   :  { %31 = dma.hbm_to_smem %s29_s19, 64, %s424_s20, [#allocation5]  }
   0x8   :  { %s425_s24 = smov [#allocation8]  }
   0x9   :  { %40 = dma.vmem_to_smem %s38_s23, 16, %s425_s24, [#allocation6]  }
   0xa   :  { %415 = dma.done.wait [#allocation3], 64  }
   0xb   :  { %416 = vsyncadd [#allocation3], 4294967232 }
   0xc   :  { %417 = dma.done.wait [#allocation5], 64  }
   0xd   :  { %418 = vsyncadd [#allocation5], 4294967232 }
   0xe   :  { %419 = dma.done.wait [#allocation6], 16  }
   0xf   :  { %420 = vsyncadd [#allocation6], 4294967280 }
  0x10   :  { %53 = sfence }
  0x11   :  { %v459_v0 = vld [vmem:[#allocation2] sm:$0xf]  ;;  %s310_s0 = sld [smem:[#allocation7 + $0x81]]  ;;  %s426_s1 = smov 96   ;;  %vm276_vm0 = vcmask 261120   ;;  %vm278_vm1 = vcmask 523264  }
  0x12   :  { %91 = vrot.lane.b32.xlu1 %v459_v0, %s426_s1  ;;  %s311_s25 = sld [smem:[#allocation7 + $0x82]]  ;;  %s427_s2 = smov 64   ;;  %v493_v32 = vrot.slane %v459_v0, 2  ;;  %vm280_vm2 = vcmask 785408  }
  0x13   :  { %s312_s26 = sld [smem:[#allocation7 + $0x83]]  ;;  %99 = vrot.lane.b32.xlu2 %v459_v0, %s427_s2  ;;  %s428_s30 = smov 32  }
  0x14   :  { %s320_s27 = sld [smem:[#allocation7 + $0x102]] }
  0x15   :  { %s321_s28 = sld [smem:[#allocation7 + $0x103]] }
  0x16   :  { %s319_s29 = sld [smem:[#allocation7 + $0x101]] }
  0x17   :  { %v121_v1 = vstv %s310_s0  ;;  %s330_s4 = sld [smem:[#allocation7 + $0x183]] }
  0x18   :  { %v122_v2 = vmul.f32 %v121_v1, %v459_v0  ;;  %v129_v5 = vstv %s311_s25  ;;  %s329_s5 = sld [smem:[#allocation7 + $0x182]] }
  0x19   :  { %v137_v3 = vstv %s312_s26  ;;  %v130_v7 = vmul.f32 %v129_v5, %v459_v0  ;;  %s328_s6 = sld [smem:[#allocation7 + $0x181]] }
  0x1a   :  { %124 = vrot.lane.b32.xlu0 %v122_v2, %s426_s1  ;;  %v138_v4 = vmul.f32 %v137_v3, %v459_v0  ;;  %v176_v6 = vstv %s320_s27  ;;  %s304_s7 = sld [smem:[#allocation7 + $0x3]] }
  0x1b   :  { %107 = vrot.lane.b32.xlu2 %v459_v0, %s428_s30  ;;  %v177_v8 = vmul.f32 %v176_v6, %v459_v0  ;;  %v184_v9 = vstv %s321_s28  ;;  %s303_s8 = sld [smem:[#allocation7 + $0x2]] }
  0x1c   :  { %140 = vrot.lane.b32.xlu1 %v138_v4, %s428_s30  ;;  %v185_v10 = vmul.f32 %v184_v9, %v459_v0  ;;  %v168_v11 = vstv %s319_s29  ;;  %s302_s9 = sld [smem:[#allocation7 + $0x1]] }
  0x1d   :  { %v231_v12 = vstv %s330_s4  ;;  %v169_v14 = vmul.f32 %v168_v11, %v459_v0  ;;  %s309_s10 = sld [smem:[#allocation7 + $0x80]] }
  0x1e   :  { %v223_v13 = vstv %s329_s5  ;;  %v232_v15 = vmul.f32 %v231_v12, %v459_v0  ;;  %s313_s11 = sld [smem:[#allocation7 + $0x84]] }
  0x1f   :  { %v224_v16 = vmul.f32 %v223_v13, %v459_v0  ;;  %v215_v17 = vstv %s328_s6  ;;  %s314_s12 = sld [smem:[#allocation7 + $0x85]]  ;;  %s429_s6 = smov [#allocation9]  }
  0x20   :  { %v75_v18 = vstv %s304_s7  ;;  %v216_v20 = vmul.f32 %v215_v17, %v459_v0  ;;  %s318_s13 = sld [smem:[#allocation7 + $0x100]]  ;;  %s288_s7 = sshll.u32 %s429_s6, 4  ;;  %s289_s7 = int_to_ptr.vmem [resolvable:$true] %s288_s7 }
  0x21   :  { %v67_v19 = vstv %s303_s8  ;;  %v76_v21 = vmul.f32 %v75_v18, %v459_v0  ;;  %s315_s14 = sld [smem:[#allocation7 + $0x86]] }
  0x22   :  { %132 = vrot.lane.b32.xlu0 %v130_v7, %s427_s2  ;;  %v68_v22 = vmul.f32 %v67_v19, %v459_v0  ;;  %v59_v23 = vstv %s302_s9  ;;  %s316_s15 = sld [smem:[#allocation7 + $0x87]] }
  0x23   :  { %187 = vrot.lane.b32.xlu2 %v185_v10, %s428_s30  ;;  %v60_v24 = vmul.f32 %v59_v23, %v459_v0  ;;  %v118_v27 = vstv %s309_s10  ;;  %s495_s16 = sld [smem:[#allocation7 + $0x104]]  ;;  %s290_s10 = sshll.u32 %s577_s3, 4  ;;  %s291_s10 = int_to_ptr.hbm [resolvable:$true] %s290_s10 }
  0x24   :  { %179 = vrot.lane.b32.xlu1 %v177_v8, %s427_s2  ;;  %v119_v30 = vmul.f32 %v118_v27, %v459_v0  ;;  %v145_v33 = vstv %s313_s11  ;;  %s500_s17 = sld [smem:[#allocation7 + $0x180]] }
  0x25   :  { %v146_v38 = vmul.f32 %v145_v33, %v493_v32  ;;  %v149_v39 = vstv %s314_s12  ;;  %s502_s18 = sld [smem:[#allocation8 + $0x1]] }
  0x26   :  { %v165_v40 = vstv %s318_s13  ;;  %s506_s19 = sld [smem:[#allocation7 + $0x105]] }
  0x27   :  { %v153_v43 = vstv %s315_s14  ;;  %v166_v48 = vmul.f32 %v165_v40, %v459_v0  ;;  %s512_s20 = sld [smem:[#allocation7 + $0x106]] }
  0x28   :  { %v157_v49 = vstv %s316_s15  ;;  %s515_s21 = sld [smem:[#allocation7 + $0x107]] }
  0x29   :  { %v192_v54 = vstv %s495_s16  ;;  %s518_s22 = sld [smem:[#allocation7 + $0x184]] }
  0x2a   :  { %171 = vrot.lane.b32.xlu0 %v169_v14, %s426_s1  ;;  %v212_v58 = vstv %s500_s17  ;;  %s522_s23 = sld [smem:[#allocation7]]  ;;  %v193_v61 = vmul.f32 %v192_v54, %v493_v32 }
  0x2b   :  { %234 = vrot.lane.b32.xlu2 %v232_v15, %s428_s30  ;;  %v161_v59 = vstv %s502_s18  ;;  %s526_s24 = sld [smem:[#allocation7 + $0x185]]  ;;  %v213_v2 = vmul.f32 %v212_v58, %v459_v0 }
  0x2c   :  { %226 = vrot.lane.b32.xlu1 %v224_v16, %s427_s2  ;;  %v196_v63 = vstv %s506_s19  ;;  %s529_s0 = sld [smem:[#allocation8 + $0x2]] }
  0x2d   :  { %v200_v4 = vstv %s512_s20  ;;  %s533_s25 = sld [smem:[#allocation7 + $0x186]] }
  0x2e   :  { %s535_s26 = sld [smem:[#allocation7 + $0x187]]  ;;  %v204_v9 = vstv %s515_s21 }
  0x2f   :  { %v239_v11 = vstv %s518_s22  ;;  %s540_s27 = sld [smem:[#allocation7 + $0x4]] }
  0x30   :  { %v56_v16 = vstv %s522_s23  ;;  %s545_s28 = sld [smem:[#allocation8 + $0x3]] }
  0x31   :  { %s550_s29 = sld [smem:[#allocation7 + $0x5]] }
  0x32   :  { %218 = vrot.lane.b32.xlu0 %v216_v20, %s426_s1  ;;  %v240_v20 = vmul.f32 %v239_v11, %v493_v32  ;;  %s554_s4 = sld [smem:[#allocation7 + $0x6]] }
  0x33   :  { %78 = vrot.lane.b32.xlu2 %v76_v21, %s428_s30  ;;  %v243_v21 = vstv %s526_s24  ;;  %s308_s5 = sld [smem:[#allocation7 + $0x7]] }
  0x34   :  { %70 = vrot.lane.b32.xlu1 %v68_v22, %s427_s2  ;;  %v208_v22 = vstv %s529_s0 }
  0x3a   :  { %62 = vrot.lane.b32.xlu0 %v60_v24, %s426_s1 }
  0x6d   :  { %v100_v26 = vpop.permute.xlu2 %99 }
  0x6e   :  { %v504_v41 = vrot.slane %v100_v26, 2  ;;  %v247_v26 = vstv %s533_s25 }
  0x70   :  { %v154_v51 = vmul.f32 %v153_v43, %v504_v41  ;;  %v201_v13 = vmul.f32 %v200_v4, %v504_v41 }
  0x75   :  { %v108_v31 = vpop.permute.xlu2 %107 }
  0x76   :  { %v509_v47 = vrot.slane %v108_v31, 2 }
  0x78   :  { %v158_v56 = vmul.f32 %v157_v49, %v509_v47  ;;  %v205_v17 = vmul.f32 %v204_v9, %v509_v47 }
  0x7d   :  { %v188_v50 = vpop.permute.xlu2 %187 }
  0x84   :  { %v92_v25 = vpop.permute.xlu1 %91 }
  0x85   :  { %v497_v36 = vrot.slane %v92_v25, 2  ;;  %v235_v12 = vpop.permute.xlu2 %234  ;;  %v57_v25 = vmul.f32 %v56_v16, %v459_v0 }
  0x87   :  { %v150_v45 = vmul.f32 %v149_v39, %v497_v36  ;;  %v197_v6 = vmul.f32 %v196_v63, %v497_v36  ;;  %v244_v27 = vmul.f32 %v243_v21, %v497_v36 }
  0x8c   :  { %v125_v28 = vpop.permute.xlu0 %124 }
  0x8d   :  { %v127_v34 = vadd.f32 %v125_v28, %v119_v30  ;;  %v251_v30 = vstv %s535_s26  ;;  %v79_v40 = vpop.permute.xlu2 %78 }
  0x8e   :  { %v141_v29 = vpop.permute.xlu1 %140 }
  0x94   :  { %v133_v35 = vpop.permute.xlu0 %132 }
  0x95   :  { %v135_v37 = vadd.f32 %v133_v35, %v127_v34  ;;  %v83_v35 = vstv %s540_s27 }
  0x96   :  { %v180_v44 = vpop.permute.xlu1 %179 }
  0x97   :  { %v143_v42 = vadd.f32 %v141_v29, %v135_v37  ;;  %v248_v37 = vmul.f32 %v247_v26, %v504_v41 }
  0x99   :  { %v147_v46 = vadd.f32 %v146_v38, %v143_v42  ;;  %v252_v42 = vmul.f32 %v251_v30, %v509_v47 }
  0x9b   :  { %v151_v52 = vadd.f32 %v150_v45, %v147_v46  ;;  %v87_v45 = vmul.f32 %v493_v32, %v83_v35  ;;  %v255_v46 = vstv %s545_s28 }
  0x9c   :  { %v172_v53 = vpop.permute.xlu0 %171 }
  0x9d   :  { %v155_v55 = vadd.f32 %v154_v51, %v151_v52  ;;  %v174_v57 = vadd.f32 %v172_v53, %v166_v48  ;;  %v90_v48 = vstv %s550_s29  ;;  %v98_v51 = vstv %s554_s4 }
  0x9e   :  { %v227_v5 = vpop.permute.xlu1 %226  ;;  %v95_v53 = vmul.f32 %v497_v36, %v90_v48 }
  0x9f   :  { %v182_v60 = vadd.f32 %v180_v44, %v174_v57  ;;  %v159_v62 = vadd.f32 %v158_v56, %v155_v55  ;;  %v106_v55 = vstv %s308_s5  ;;  %v103_v57 = vmul.f32 %v504_v41, %v98_v51 }
  0xa1   :  { %v190_v1 = vadd.f32 %v188_v50, %v182_v60  ;;  %v162_v3 = vadd.f32 %v161_v59, %v159_v62  ;;  %v111_v60 = vmul.f32 %v509_v47, %v106_v55 }
  0xa3   :  { %v194_v7 = vadd.f32 %v193_v61, %v190_v1  ;;  %v163_v8 = vmax.f32 %v162_v3, 0.0 }
  0xa4   :  { %v219_v10 = vpop.permute.xlu0 %218 }
  0xa5   :  { %v198_v14 = vadd.f32 %v197_v6, %v194_v7  ;;  %v221_v15 = vadd.f32 %v219_v10, %v213_v2  ;;  %259 = vst [vmem:[#allocation1] ss:$4 sm:$0xff] %v163_v8 }
  0xa6   :  { %v71_v34 = vpop.permute.xlu1 %70 }
  0xa7   :  { %v202_v18 = vadd.f32 %v201_v13, %v198_v14  ;;  %v229_v19 = vadd.f32 %v227_v5, %v221_v15 }
  0xa9   :  { %v206_v23 = vadd.f32 %v205_v17, %v202_v18  ;;  %v237_v24 = vadd.f32 %v235_v12, %v229_v19 }
  0xab   :  { %v241_v28 = vadd.f32 %v240_v20, %v237_v24  ;;  %v209_v29 = vadd.f32 %v208_v22, %v206_v23 }
  0xac   :  { %v63_v31 = vpop.permute.xlu0 %62  ;;  %v260_v33 = vld.sshfl [vmem:[#allocation1] sm:$0xff pattern:$0x73625140] }
  0xad   :  { %v245_v38 = vadd.f32 %v244_v27, %v241_v28  ;;  %v65_v0 = vadd.f32 %v63_v31, %v57_v25  ;;  %v210_v39 = vmax.f32 %v209_v29, 0.0  ;;  %261 = vrot.lane.b32.xlu0 %v260_v33, %s428_s30  ;;  %s113_s30 = sld [smem:[#allocation8]] }
  0xaf   :  { %v249_v43 = vadd.f32 %v248_v37, %v245_v38  ;;  %265 = vst [vmem:[#allocation1] ss:$4 sm:$0xff] %v210_v39  ;;  %v73_v44 = vadd.f32 %v71_v34, %v65_v0 }
  0xb1   :  { %v253_v49 = vadd.f32 %v252_v42, %v249_v43  ;;  %v81_v50 = vadd.f32 %v79_v40, %v73_v44 }
  0xb3   :  { %v256_v52 = vadd.f32 %v255_v46, %v253_v49  ;;  %v88_v54 = vadd.f32 %v87_v45, %v81_v50  ;;  %v114_v63 = vstv %s113_s30 }
  0xb5   :  { %v257_v56 = vmax.f32 %v256_v52, 0.0  ;;  %v96_v58 = vadd.f32 %v95_v53, %v88_v54 }
  0xb6   :  { %v266_v59 = vld.sshfl [vmem:[#allocation1] sm:$0xff pattern:$0x73625140] }
  0xb7   :  { %v104_v61 = vadd.f32 %v103_v57, %v96_v58  ;;  %271 = vst [vmem:[#allocation1] ss:$4 sm:$0xff] %v257_v56  ;;  %267 = vrot.lane.b32.xlu1 %v266_v59, %s427_s2 }
  0xb9   :  { %v112_v32 = vadd.f32 %v111_v60, %v104_v61 }
  0xbb   :  { %v115_v36 = vadd.f32 %v114_v63, %v112_v32 }
  0xbd   :  { %v116_v2 = vmax.f32 %v115_v36, 0.0 }
  0xbe   :  { %v272_v62 = vld.sshfl [vmem:[#allocation1] sm:$0xff pattern:$0x73625140] }
  0xbf   :  { %273 = vrot.lane.b32.xlu2 %v272_v62, %s426_s1 }
 0x119   :  { %v274_v3 = vpop.permute.xlu2 %273 }
 0x11f   :  { %v262_v1 = vpop.permute.xlu0 %261 }
 0x120   :  { %v277_v41 = vsel %vm276_vm0, %v116_v2, %v262_v1 }
 0x129   :  { %v268_v47 = vpop.permute.xlu1 %267 }
 0x12a   :  { %v279_v4 = vsel %vm278_vm1, %v277_v41, %v268_v47 }
 0x12b   :  { %v281_v5 = vsel %vm280_vm2, %v279_v4, %v274_v3 }
 0x12c   :  { %282 = vst [vmem:[#allocation9] sm:$0x3] %v281_v5 }
 0x12d   :  { %293 = dma.vmem_to_hbm [thread:$0]  %s289_s7, 32, %s291_s10, [#allocation4]  }
 0x12e   :  { %421 = dma.done.wait [#allocation4], 32  }
 0x12f   :  { %422 = vsyncadd [#allocation4], 4294967264 }
 0x130   :  { %298 = vsyncpa [#allocation3], 1 }
 0x131   :  { %299 = vsyncpa [#allocation4], 1 }
 0x132   :  { %300 = vsyncpa [#allocation5], 1 }
 0x133   :  { %301 = vsyncpa [#allocation6], 1 }

</bundles_post_ra>
